<compile_context>
chip_gen: v5e
topology: v5e:2x2
jax: 0.10.0
libtpu: 0.0.40
codegen_flags: <defaults>
</compile_context>

<pallas_src>
import functools

import jax
import jax.numpy as jnp
from jax.experimental import pallas as pl
from jax.experimental.pallas import tpu as pltpu

_LANE = 128


def _round_up(x, m):
    return ((x + m - 1) // m) * m


def _vmem_limit_bytes():
    """Generation-aware scoped-VMEM limit (~3/4 of physical, <= 100 MiB)."""
    cap = 64 * 1024 * 1024  # conservative fallback (v7x per-TC VMEM)
    try:
        info = pltpu.get_tpu_info()
        cap = int(getattr(info, "vmem_capacity_bytes", cap))
    except Exception:
        pass
    return max(32 * 1024 * 1024, min(cap * 3 // 4, 100 * 1024 * 1024))


# ---------------------------------------------------------------------------
# Fused single-call kernel: A resident in VMEM, read from HBM exactly once.
# ---------------------------------------------------------------------------
def _gcn_fused_kernel(a_ref, x_ref, w1_ref, b1_ref, w2_ref, b2_ref,
                      w3_ref, b3_ref, o_ref):
    a = a_ref[...]                       # (Np, Np), bf16 or f32
    cd = a.dtype                         # compute dtype for the A matmuls
    xw1 = jnp.dot(x_ref[...], w1_ref[...], preferred_element_type=jnp.float32)
    h1 = jnp.maximum(
        jnp.dot(a, xw1.astype(cd), preferred_element_type=jnp.float32)
        + b1_ref[...], 0.0)
    # dropout(training=False) == identity
    h1w2 = jnp.dot(h1, w2_ref[...], preferred_element_type=jnp.float32)
    h2 = jnp.maximum(
        jnp.dot(a, h1w2.astype(cd), preferred_element_type=jnp.float32)
        + b2_ref[...], 0.0)
    o_ref[...] = (jnp.dot(h2, w3_ref[...], preferred_element_type=jnp.float32)
                  + b3_ref[...]).astype(o_ref.dtype)


def _gcn_fused_call(a, x, w1, b1, w2, b2, w3, b3, vmem_limit):
    # TODO(synk): fused path runs on one TensorCore (no grid); fine for the
    #             small graphs it is gated to, large N falls back to streaming.
    n_pad = a.shape[0]
    f_out_p = w3.shape[1]
    c1, c2 = w1.shape[1], w2.shape[1]
    flops = 2 * n_pad * (x.shape[1] * c1 + n_pad * c1 + c1 * c2
                         + n_pad * c2 + c2 * f_out_p)
    bytes_accessed = (n_pad * n_pad * a.dtype.itemsize
                      + n_pad * (x.shape[1] + f_out_p) * 4)
    vspec = lambda: pl.BlockSpec(memory_space=pltpu.MemorySpace.VMEM)
    return pl.pallas_call(
        _gcn_fused_kernel,
        out_shape=jax.ShapeDtypeStruct((n_pad, f_out_p), jnp.float32),
        in_specs=[vspec() for _ in range(8)],
        out_specs=vspec(),
        compiler_params=pltpu.CompilerParams(vmem_limit_bytes=vmem_limit),
        cost_estimate=pl.CostEstimate(flops=flops, transcendentals=0,
                                      bytes_accessed=bytes_accessed),
    )(a, x, w1, b1, w2, b2, w3, b3)


# ---------------------------------------------------------------------------
# Streaming kernel (large N): A tiled (tm, tk) from HBM; HW operand is a
# whole-array VMEM-resident slab sliced in-kernel; epilogue fuses
# relu(.+b) @ W_e + b_e (pass 1: W2, zero bias; pass 2: W3, b3 -> final y).
# ---------------------------------------------------------------------------
def _gcn_stream_kernel(a_ref, hw_ref, b_ref, we_ref, be_ref, o_ref, acc_ref,
                       *, tk):
    k = pl.program_id(1)

    @pl.when(k == 0)
    def _init():
        acc_ref[...] = jnp.zeros_like(acc_ref)

    kk = pl.multiple_of(k * tk, tk)
    acc_ref[...] += jnp.dot(a_ref[...], hw_ref[pl.ds(kk, tk), :],
                            preferred_element_type=jnp.float32)

    @pl.when(k == pl.num_programs(1) - 1)
    def _finalize():
        h = jnp.maximum(acc_ref[...] + b_ref[...], 0.0)
        y = jnp.dot(h, we_ref[...],
                    preferred_element_type=jnp.float32) + be_ref[...]
        o_ref[...] = y.astype(o_ref.dtype)


def _divisor_tiles(n_pad, cap):
    return [t for t in range(_LANE, min(n_pad, cap) + 1, _LANE)
            if n_pad % t == 0]


def _pick_tiles(n_pad, a_bytes, c_mid, c_out, vmem_limit):
    budget = int(0.8 * vmem_limit)
    resident = 2 * n_pad * c_mid * a_bytes          # HW slab (conservative x2)
    tm_cands = _divisor_tiles(n_pad, 1024)
    tm2 = [t for t in tm_cands if n_pad // t >= 2]  # >=2 row blocks for v7x
    tm = max(tm2) if tm2 else max(tm_cands)
    tk = _LANE
    for t in sorted(_divisor_tiles(n_pad, 2048), reverse=True):
        need = (resident + 2 * tm * t * a_bytes      # double-buffered A tiles
                + 2 * tm * c_out * 4 + tm * c_mid * 4)
        if need <= budget:
            tk = t
            break
    return tm, tk


def _gcn_stream_pass(a, hw, b, w_e, b_e, *, out_dtype, vmem_limit):
    n_pad = a.shape[0]
    c_mid = hw.shape[1]
    c_out = w_e.shape[1]
    a_bytes = a.dtype.itemsize
    tm, tk = _pick_tiles(n_pad, a_bytes, c_mid, c_out, vmem_limit)
    grid = (n_pad // tm, n_pad // tk)

    flops = 2 * n_pad * n_pad * c_mid + 2 * n_pad * c_mid * c_out
    bytes_accessed = (n_pad * n_pad * a_bytes                 # A (dominant)
                      + n_pad * c_mid * hw.dtype.itemsize     # resident HW
                      + n_pad * c_out * jnp.dtype(out_dtype).itemsize
                      + (c_mid * c_out + c_mid + c_out) * 4)

    return pl.pallas_call(
        functools.partial(_gcn_stream_kernel, tk=tk),
        out_shape=jax.ShapeDtypeStruct((n_pad, c_out), out_dtype),
        grid=grid,
        in_specs=[
            pl.BlockSpec((tm, tk), lambda i, k: (i, k)),        # A (streamed)
            pl.BlockSpec((n_pad, c_mid), lambda i, k: (0, 0)),  # HW (resident)
            pl.BlockSpec((1, c_mid), lambda i, k: (0, 0)),      # conv bias
            pl.BlockSpec((c_mid, c_out), lambda i, k: (0, 0)),  # epilogue W
            pl.BlockSpec((1, c_out), lambda i, k: (0, 0)),      # epilogue b
        ],
        out_specs=pl.BlockSpec((tm, c_out), lambda i, k: (i, 0)),
        scratch_shapes=[pltpu.VMEM((tm, c_mid), jnp.float32)],
        compiler_params=pltpu.CompilerParams(
            dimension_semantics=("parallel", "arbitrary"),
            vmem_limit_bytes=vmem_limit),
        cost_estimate=pl.CostEstimate(flops=flops, transcendentals=0,
                                      bytes_accessed=bytes_accessed),
    )(a, hw, b, w_e, b_e)


# ---------------------------------------------------------------------------
# Wrapper: lane-dense padding + fused/streaming dispatch
# ---------------------------------------------------------------------------
def _pad2(m, rows, cols, dtype=jnp.float32):
    out = jnp.zeros((rows, cols), dtype)  # padded region is exactly zero
    return out.at[:m.shape[0], :m.shape[1]].set(m.astype(dtype))


def graph_model_forward(a_hat, x, params, *, a_dtype=jnp.bfloat16,
                        force_streaming=False):
    """GraphModel forward.  a_hat: [N,N] f32 normalized adjacency, x: [N,F_in].

    A_hat is handled in `a_dtype` (bf16 default); accumulation is f32.
    Returns [N, F_in] f32.
    """
    w1, b1, w2, b2, w3, b3 = params
    n, f_in = x.shape
    f_out = w3.shape[1]

    n_pad = _round_up(max(n, 8), _LANE)
    f_in_p = _round_up(f_in, _LANE)
    h1_p = _round_up(w1.shape[1], _LANE)
    lat_p = _round_up(w2.shape[1], _LANE)
    f_out_p = _round_up(f_out, _LANE)

    a_bytes = jnp.dtype(a_dtype).itemsize
    vmem_limit = _vmem_limit_bytes()

    a_p = _pad2(a_hat, n_pad, n_pad, dtype=a_dtype)
    x_p = _pad2(x, n_pad, f_in_p)
    w1_p, b1_p = _pad2(w1, f_in_p, h1_p), _pad2(b1, 1, h1_p)
    w2_p, b2_p = _pad2(w2, h1_p, lat_p), _pad2(b2, 1, lat_p)
    w3_p, b3_p = _pad2(w3, lat_p, f_out_p), _pad2(b3, 1, f_out_p)

    # Fused-path budget: A (x1.2 safety) + f32 intermediates.
    fused_bytes = (int(1.2 * n_pad * n_pad * a_bytes)
                   + n_pad * (f_in_p + f_out_p + 6 * _LANE) * 4)
    if not force_streaming and fused_bytes <= int(0.6 * vmem_limit):
        y = _gcn_fused_call(a_p, x_p, w1_p, b1_p, w2_p, b2_p, w3_p, b3_p,
                            vmem_limit)
    else:
        # XW1 computed once in the wrapper (removes the per-row-block H stream).
        xw1 = jnp.dot(x_p, w1_p,
                      preferred_element_type=jnp.float32).astype(a_dtype)
        # pass 1 (A read #1): HW2 = relu(A @ XW1 + b1) @ W2  (a_dtype output)
        hw2 = _gcn_stream_pass(a_p, xw1, b1_p, w2_p,
                               jnp.zeros((1, lat_p), jnp.float32),
                               out_dtype=a_dtype, vmem_limit=vmem_limit)
        # pass 2 (A read #2): Y = relu(A @ HW2 + b2) @ W3 + b3
        y = _gcn_stream_pass(a_p, hw2, b2_p, w3_p, b3_p,
                             out_dtype=jnp.float32, vmem_limit=vmem_limit)
    return y[:n, :f_out]


# ---------------------------------------------------------------------------
# Glue: dense GCN-normalized adjacency, params, pure-JAX reference
# ---------------------------------------------------------------------------
def build_normalized_adjacency(edge_index, num_nodes):
    """Dense GCN-normalized adjacency mirroring PyG gcn_norm semantics."""
    src, dst = edge_index[0], edge_index[1]
    a = jnp.zeros((num_nodes, num_nodes), jnp.float32).at[dst, src].add(1.0)
    diag = jnp.diagonal(a)
    a = a + jnp.diag(jnp.where(diag == 0.0, 1.0, 0.0))
    deg = jnp.sum(a, axis=1)
    dinv = jnp.where(deg > 0.0, jax.lax.rsqrt(deg), 0.0)
    return a * dinv[:, None] * dinv[None, :]


def init_params(key, input_dim, latent_dim):
    h1 = 2 * latent_dim
    ks = jax.random.split(key, 3)

    def glorot(k, fan_in, fan_out):
        lim = (6.0 / (fan_in + fan_out)) ** 0.5
        return jax.random.uniform(k, (fan_in, fan_out), jnp.float32, -lim, lim)

    w1 = glorot(ks[0], input_dim, h1)
    b1 = jnp.zeros((1, h1), jnp.float32)
    w2 = glorot(ks[1], h1, latent_dim)
    b2 = jnp.zeros((1, latent_dim), jnp.float32)
    w3 = glorot(ks[2], latent_dim, input_dim)   # nn.Linear(latent, input).T
    b3 = jnp.zeros((1, input_dim), jnp.float32)
    return (w1, b1, w2, b2, w3, b3)


def reference_forward(a_hat, x, params):
    w1, b1, w2, b2, w3, b3 = params
    h = jnp.maximum(a_hat @ (x @ w1) + b1, 0.0)
    h = jnp.maximum(a_hat @ (h @ w2) + b2, 0.0)
    return h @ w3 + b3


if __name__ == "__main__":
    key = jax.random.PRNGKey(0)
    k_x, k_e, k_p, k_x2, k_e2 = jax.random.split(key, 5)

    input_dim = 4
    latent_dim = 32
    params = init_params(k_p, input_dim, latent_dim)

    # --- small graph (harness size) -> fused resident-A single-call path ----
    num_nodes, num_edges = 16, 32
    x = jax.random.normal(k_x, (num_nodes, input_dim), jnp.float32)
    edge_index = jax.random.randint(k_e, (2, num_edges), 0, num_nodes,
                                    dtype=jnp.int32)
    a_hat = build_normalized_adjacency(edge_index, num_nodes)
    ref = reference_forward(a_hat, x, params)

    out_f32 = jax.block_until_ready(
        graph_model_forward(a_hat, x, params, a_dtype=jnp.float32))
    assert out_f32.shape == (num_nodes, input_dim)
    assert jnp.allclose(out_f32, ref, atol=1e-4, rtol=1e-4), "fused f32 mismatch"

    out_bf16 = jax.block_until_ready(graph_model_forward(a_hat, x, params))
    assert out_bf16.shape == (num_nodes, input_dim)
    assert jnp.allclose(out_bf16, ref, atol=1e-1, rtol=1e-1), "fused bf16 mismatch"

    # --- larger graph, streaming path exercised explicitly ------------------
    n2, e2 = 1024, 4096
    x2 = jax.random.normal(k_x2, (n2, input_dim), jnp.float32)
    ei2 = jax.random.randint(k_e2, (2, e2), 0, n2, dtype=jnp.int32)
    a2 = build_normalized_adjacency(ei2, n2)
    ref2 = reference_forward(a2, x2, params)

    s_f32 = jax.block_until_ready(
        graph_model_forward(a2, x2, params, a_dtype=jnp.float32,
                            force_streaming=True))
    assert s_f32.shape == (n2, input_dim)
    assert jnp.allclose(s_f32, ref2, atol=1e-4, rtol=1e-4), "stream f32 mismatch"

    s_bf16 = jax.block_until_ready(
        graph_model_forward(a2, x2, params, force_streaming=True))
    assert s_bf16.shape == (n2, input_dim)
    assert jnp.allclose(s_bf16, ref2, atol=1e-1, rtol=1e-1), "stream bf16 mismatch"

    print("KERNEL_OK")
</pallas_src>

<mosaic_0001>
module attributes {stable_mosaic.version = 11 : i64} {
  func.func @_gcn_fused_kernel(%arg0: memref<128x128xf32, #tpu.memory_space<vmem>>, %arg1: memref<128x128xf32, #tpu.memory_space<vmem>>, %arg2: memref<128x128xf32, #tpu.memory_space<vmem>>, %arg3: memref<1x128xf32, #tpu.memory_space<vmem>>, %arg4: memref<128x128xf32, #tpu.memory_space<vmem>>, %arg5: memref<1x128xf32, #tpu.memory_space<vmem>>, %arg6: memref<128x128xf32, #tpu.memory_space<vmem>>, %arg7: memref<1x128xf32, #tpu.memory_space<vmem>>, %arg8: memref<128x128xf32, #tpu.memory_space<vmem>>) attributes {dimension_semantics = [], scalar_prefetch = 0 : i64, scratch_operands = 0 : i64, tpu.core_type = #tpu.core_type<tc>} {
    %c0 = arith.constant 0 : index
    %c0_0 = arith.constant 0 : index
    %0 = vector.load %arg0[%c0, %c0_0] : memref<128x128xf32, #tpu.memory_space<vmem>>, vector<128x128xf32>
    %c0_1 = arith.constant 0 : index
    %c0_2 = arith.constant 0 : index
    %1 = vector.load %arg1[%c0_1, %c0_2] : memref<128x128xf32, #tpu.memory_space<vmem>>, vector<128x128xf32>
    %c0_3 = arith.constant 0 : index
    %c0_4 = arith.constant 0 : index
    %2 = vector.load %arg2[%c0_3, %c0_4] : memref<128x128xf32, #tpu.memory_space<vmem>>, vector<128x128xf32>
    %cst = arith.constant dense<0.000000e+00> : vector<128x128xf32>
    %3 = tpu.matmul %1, %2, %cst {dimension_numbers = #tpu.dot_dimension_numbers<[1], [0], [0], [1], [0, 0, 1, 1], [], []>} : vector<128x128xf32>, vector<128x128xf32>, vector<128x128xf32> -> vector<128x128xf32>
    %cst_5 = arith.constant dense<0.000000e+00> : vector<128x128xf32>
    %4 = tpu.matmul %0, %3, %cst_5 {dimension_numbers = #tpu.dot_dimension_numbers<[1], [0], [0], [1], [0, 0, 1, 1], [], []>} : vector<128x128xf32>, vector<128x128xf32>, vector<128x128xf32> -> vector<128x128xf32>
    %c0_6 = arith.constant 0 : index
    %c0_7 = arith.constant 0 : index
    %5 = vector.load %arg3[%c0_6, %c0_7] : memref<1x128xf32, #tpu.memory_space<vmem>>, vector<1x128xf32>
    %6 = vector.broadcast %5 : vector<1x128xf32> to vector<128x128xf32>
    %7 = arith.addf %4, %6 : vector<128x128xf32>
    %cst_8 = arith.constant 0.000000e+00 : f32
    %8 = vector.broadcast %cst_8 : f32 to vector<128x128xf32>
    %9 = arith.maximumf %7, %8 : vector<128x128xf32>
    %c0_9 = arith.constant 0 : index
    %c0_10 = arith.constant 0 : index
    %10 = vector.load %arg4[%c0_9, %c0_10] : memref<128x128xf32, #tpu.memory_space<vmem>>, vector<128x128xf32>
    %cst_11 = arith.constant dense<0.000000e+00> : vector<128x128xf32>
    %11 = tpu.matmul %9, %10, %cst_11 {dimension_numbers = #tpu.dot_dimension_numbers<[1], [0], [0], [1], [0, 0, 1, 1], [], []>} : vector<128x128xf32>, vector<128x128xf32>, vector<128x128xf32> -> vector<128x128xf32>
    %cst_12 = arith.constant dense<0.000000e+00> : vector<128x128xf32>
    %12 = tpu.matmul %0, %11, %cst_12 {dimension_numbers = #tpu.dot_dimension_numbers<[1], [0], [0], [1], [0, 0, 1, 1], [], []>} : vector<128x128xf32>, vector<128x128xf32>, vector<128x128xf32> -> vector<128x128xf32>
    %c0_13 = arith.constant 0 : index
    %c0_14 = arith.constant 0 : index
    %13 = vector.load %arg5[%c0_13, %c0_14] : memref<1x128xf32, #tpu.memory_space<vmem>>, vector<1x128xf32>
    %14 = vector.broadcast %13 : vector<1x128xf32> to vector<128x128xf32>
    %15 = arith.addf %12, %14 : vector<128x128xf32>
    %cst_15 = arith.constant 0.000000e+00 : f32
    %16 = vector.broadcast %cst_15 : f32 to vector<128x128xf32>
    %17 = arith.maximumf %15, %16 : vector<128x128xf32>
    %c0_16 = arith.constant 0 : index
    %c0_17 = arith.constant 0 : index
    %18 = vector.load %arg6[%c0_16, %c0_17] : memref<128x128xf32, #tpu.memory_space<vmem>>, vector<128x128xf32>
    %cst_18 = arith.constant dense<0.000000e+00> : vector<128x128xf32>
    %19 = tpu.matmul %17, %18, %cst_18 {dimension_numbers = #tpu.dot_dimension_numbers<[1], [0], [0], [1], [0, 0, 1, 1], [], []>} : vector<128x128xf32>, vector<128x128xf32>, vector<128x128xf32> -> vector<128x128xf32>
    %c0_19 = arith.constant 0 : index
    %c0_20 = arith.constant 0 : index
    %20 = vector.load %arg7[%c0_19, %c0_20] : memref<1x128xf32, #tpu.memory_space<vmem>>, vector<1x128xf32>
    %21 = vector.broadcast %20 : vector<1x128xf32> to vector<128x128xf32>
    %22 = arith.addf %19, %21 : vector<128x128xf32>
    %c0_21 = arith.constant 0 : index
    %c0_22 = arith.constant 0 : index
    %23 = vector.load %arg8[%c0_21, %c0_22] : memref<128x128xf32, #tpu.memory_space<vmem>>, vector<128x128xf32>
    tpu.vector_store %arg8[%c0_21, %c0_22], %22 {strides = array<i32>} : memref<128x128xf32, #tpu.memory_space<vmem>>, vector<128x128xf32>,
    return
  }
}

</mosaic_0001>

<bundles_post_ra>
// kernel: tpu_custom_call.1
= control target key start
LH: loop header
LB: loop body
LE: loop exit
PB: predicated region body
PF: predicated region fallthrough
CT: control target
= control target key end

     0   :  { %13 = vsyncpa [#allocation3], 0  ;;  %s967_s0 = inlined_call_operand.hbm [shape: f32[128,128], index: 0, kind: input, shape index: {}]   ;;  %s968_s1 = inlined_call_operand.hbm [shape: f32[128,128], index: 1, kind: input, shape index: {}]   ;;  %s969_s2 = inlined_call_operand.hbm [shape: f32[128,128], index: 2, kind: input, shape index: {}]   ;;  %s970_s3 = inlined_call_operand.vmem [shape: f32[1,128], index: 3, kind: input, shape index: {}]   ;;  %s971_s4 = inlined_call_operand.hbm [shape: f32[128,128], index: 4, kind: input, shape index: {}]   ;;  %s972_s5 = inlined_call_operand.vmem [shape: f32[1,128], index: 5, kind: input, shape index: {}]   ;;  %s973_s6 = inlined_call_operand.hbm [shape: f32[128,128], index: 6, kind: input, shape index: {}]   ;;  %s974_s7 = inlined_call_operand.vmem [shape: f32[1,128], index: 7, kind: input, shape index: {}]   ;;  %s975_s8 = inlined_call_operand.hbm [shape: f32[128,128], index: 8, kind: output, shape index: {}]  }
   0x1   :  { %14 = vsyncpa [#allocation6], 0 }
   0x2   :  { %15 = vsyncpa [#allocation9], 0 }
   0x3   :  { %16 = vsyncpa [#allocation4], 0  ;;  %s34_s29 = sshll.u32 %s968_s1, 4  ;;  %s805_s30 = smov [#allocation5]   ;;  %s35_s29 = int_to_ptr.hbm [resolvable:$true] %s34_s29 }
   0x4   :  { %s36_s9 = sshll.u32 %s805_s30, 4  ;;  %s62_s12 = sshll.u32 %s971_s4, 4  ;;  %s37_s9 = int_to_ptr.vmem [resolvable:$true] %s36_s9  ;;  %s63_s12 = int_to_ptr.hbm [resolvable:$true] %s62_s12 }
   0x5   :  { %s806_s13 = smov 128   ;;  %s807_s14 = smov 8  }
   0x6   :  { %42 = dma.hbm_to_vmem [thread:$0]  %s35_s29, 2048, %s37_s9, [#allocation6], %s806_s13, %s806_s13, %s807_s14  }
   0x7   :  { %s808_s15 = smov [#allocation8]   ;;  %s21_s1 = sshll.u32 %s967_s0, 4  ;;  %s22_s1 = int_to_ptr.hbm [resolvable:$true] %s21_s1 }
   0x8   :  { %s64_s16 = sshll.u32 %s808_s15, 4  ;;  %s47_s20 = sshll.u32 %s969_s2, 4  ;;  %s65_s16 = int_to_ptr.vmem [resolvable:$true] %s64_s16  ;;  %s48_s20 = int_to_ptr.hbm [resolvable:$true] %s47_s20 }
   0x9   :  { %70 = dma.hbm_to_vmem [thread:$0]  %s63_s12, 2048, %s65_s16, [#allocation9], %s806_s13, %s806_s13, %s807_s14  }
   0xa   :  { %s809_s21 = smov [#allocation2]   ;;  %s810_s23 = smov [#allocation7]  }
   0xb   :  { %s23_s22 = sshll.u32 %s809_s21, 4  ;;  %s49_s0 = sshll.u32 %s810_s23, 4  ;;  %s24_s22 = int_to_ptr.vmem [resolvable:$true] %s23_s22  ;;  %s50_s0 = int_to_ptr.vmem [resolvable:$true] %s49_s0 }
   0xc   :  { %29 = dma.hbm_to_vmem [thread:$0]  %s22_s1, 2048, %s24_s22, [#allocation3], %s806_s13, %s806_s13, %s807_s14  }
   0xd   :  { %s77_s26 = sshll.u32 %s973_s6, 4  ;;  %s811_s2 = smov [#allocation10]   ;;  %s78_s26 = int_to_ptr.hbm [resolvable:$true] %s77_s26 }
   0xe   :  { %55 = dma.hbm_to_vmem [thread:$0]  %s48_s20, 2048, %s50_s0, [#allocation6], %s806_s13, %s806_s13, %s807_s14  }
   0xf   :  { %s79_s27 = sshll.u32 %s811_s2, 4  ;;  %s80_s27 = int_to_ptr.vmem [resolvable:$true] %s79_s27 }
  0x10   :  { %85 = dma.hbm_to_vmem [thread:$0]  %s78_s26, 2048, %s80_s27, [#allocation9], %s806_s13, %s806_s13, %s807_s14  }
  0x11   :  { %797 = dma.done.wait [#allocation3], 2048  }
  0x12   :  { %798 = vsyncadd [#allocation3], 4294965248 }
  0x13   :  { %799 = dma.done.wait [#allocation6], 4096  }
  0x14   :  { %800 = vsyncadd [#allocation6], 4294963200 }
  0x15   :  { %801 = dma.done.wait [#allocation9], 4096  }
  0x16   :  { %802 = vsyncadd [#allocation9], 4294963200  ;;  %v155_v0 = vld [vmem:[#allocation7 + $0x78] sm:$0xff]  ;;  %v154_v1 = vld [vmem:[#allocation7 + $0x70] sm:$0xff]  ;;  %s579_s12 = sshll.u32 %s975_s8, 4  ;;  %s580_s12 = int_to_ptr.hbm [resolvable:$true] %s579_s12 }
  0x17   :  { %596 = vmatpush.msra.mxu3 %v155_v0  ;;  %595 = vmatpush.msra.mxu2 %v155_v0  ;;  %v153_v2 = vld [vmem:[#allocation7 + $0x68] sm:$0xff]  ;;  %v152_v3 = vld [vmem:[#allocation7 + $0x60] sm:$0xff]  ;;  %v151_v4 = vld [vmem:[#allocation7 + $0x58] sm:$0xff] }
  0x18   :  { %594 = vmatpush.msra.mxu1 %v155_v0  ;;  %156 = vmatpush.msra.mxu0 %v155_v0  ;;  %v150_v5 = vld [vmem:[#allocation7 + $0x50] sm:$0xff]  ;;  %v149_v6 = vld [vmem:[#allocation7 + $0x48] sm:$0xff]  ;;  %v148_v7 = vld [vmem:[#allocation7 + $0x40] sm:$0xff] }
  0x19   :  { %599 = vmatpush.msra.mxu3 %v154_v1  ;;  %598 = vmatpush.msra.mxu2 %v154_v1  ;;  %v147_v8 = vld [vmem:[#allocation7 + $0x38] sm:$0xff]  ;;  %v146_v9 = vld [vmem:[#allocation7 + $0x30] sm:$0xff]  ;;  %v145_v10 = vld [vmem:[#allocation7 + $0x28] sm:$0xff] }
  0x1a   :  { %597 = vmatpush.msra.mxu1 %v154_v1  ;;  %157 = vmatpush.msra.mxu0 %v154_v1  ;;  %v144_v11 = vld [vmem:[#allocation7 + $0x20] sm:$0xff]  ;;  %v143_v12 = vld [vmem:[#allocation7 + $0x18] sm:$0xff]  ;;  %v142_v13 = vld [vmem:[#allocation7 + $0x10] sm:$0xff] }
  0x1b   :  { %602 = vmatpush.msra.mxu3 %v153_v2  ;;  %601 = vmatpush.msra.mxu2 %v153_v2  ;;  %v141_v14 = vld [vmem:[#allocation7 + $0x8] sm:$0xff]  ;;  %v140_v15 = vld [vmem:[#allocation7] sm:$0xff]  ;;  %v138_v24 = vld [vmem:[#allocation5 + $0x70] sm:$0xff] }
  0x1c   :  { %600 = vmatpush.msra.mxu1 %v153_v2  ;;  %158 = vmatpush.msra.mxu0 %v153_v2  ;;  %v136_v16 = vld [vmem:[#allocation5 + $0x60] sm:$0xff]  ;;  %v137_v20 = vld [vmem:[#allocation5 + $0x68] sm:$0xff]  ;;  %v134_v25 = vld [vmem:[#allocation5 + $0x50] sm:$0xff] }
  0x1d   :  { %605 = vmatpush.msra.mxu3 %v152_v3  ;;  %604 = vmatpush.msra.mxu2 %v152_v3  ;;  %v132_v17 = vld [vmem:[#allocation5 + $0x40] sm:$0xff]  ;;  %v133_v21 = vld [vmem:[#allocation5 + $0x48] sm:$0xff]  ;;  %v130_v26 = vld [vmem:[#allocation5 + $0x30] sm:$0xff] }
  0x1e   :  { %603 = vmatpush.msra.mxu1 %v152_v3  ;;  %159 = vmatpush.msra.mxu0 %v152_v3  ;;  %v128_v18 = vld [vmem:[#allocation5 + $0x20] sm:$0xff]  ;;  %v129_v22 = vld [vmem:[#allocation5 + $0x28] sm:$0xff]  ;;  %v126_v27 = vld [vmem:[#allocation5 + $0x10] sm:$0xff] }
  0x1f   :  { %608 = vmatpush.msra.mxu3 %v151_v4  ;;  %607 = vmatpush.msra.mxu2 %v151_v4  ;;  %v124_v19 = vld [vmem:[#allocation5] sm:$0xff]  ;;  %v125_v23 = vld [vmem:[#allocation5 + $0x8] sm:$0xff]  ;;  %v139_v28 = vld [vmem:[#allocation5 + $0x78] sm:$0xff] }
  0x20   :  { %606 = vmatpush.msra.mxu1 %v151_v4  ;;  %160 = vmatpush.msra.mxu0 %v151_v4  ;;  %v135_v29 = vld [vmem:[#allocation5 + $0x58] sm:$0xff]  ;;  %v888_v48 = vld [vmem:[#allocation2] sm:$0xff]  ;;  %v891_v49 = vld [vmem:[#allocation2 + $0x8] sm:$0xff] }
  0x21   :  { %611 = vmatpush.msra.mxu3 %v150_v5  ;;  %610 = vmatpush.msra.mxu2 %v150_v5  ;;  %v131_v30 = vld [vmem:[#allocation5 + $0x38] sm:$0xff]  ;;  %v894_v50 = vld [vmem:[#allocation2 + $0x10] sm:$0xff]  ;;  %v900_v52 = vld [vmem:[#allocation2 + $0x20] sm:$0xff] }
  0x22   :  { %609 = vmatpush.msra.mxu1 %v150_v5  ;;  %161 = vmatpush.msra.mxu0 %v150_v5  ;;  %v127_v31 = vld [vmem:[#allocation5 + $0x18] sm:$0xff]  ;;  %v903_v53 = vld [vmem:[#allocation2 + $0x28] sm:$0xff]  ;;  %v906_v54 = vld [vmem:[#allocation2 + $0x30] sm:$0xff] }
  0x23   :  { %614 = vmatpush.msra.mxu3 %v149_v6  ;;  %613 = vmatpush.msra.mxu2 %v149_v6  ;;  %v897_v51 = vld [vmem:[#allocation2 + $0x18] sm:$0xff]  ;;  %v912_v56 = vld [vmem:[#allocation2 + $0x40] sm:$0xff]  ;;  %v320_v58 = vld [vmem:[#allocation8 + $0x70] sm:$0xff] }
  0x24   :  { %612 = vmatpush.msra.mxu1 %v149_v6  ;;  %162 = vmatpush.msra.mxu0 %v149_v6  ;;  %v909_v55 = vld [vmem:[#allocation2 + $0x38] sm:$0xff]  ;;  %v319_v59 = vld [vmem:[#allocation8 + $0x68] sm:$0xff]  ;;  %v318_v61 = vld [vmem:[#allocation8 + $0x60] sm:$0xff] }
  0x25   :  { %617 = vmatpush.msra.mxu3 %v148_v7  ;;  %616 = vmatpush.msra.mxu2 %v148_v7  ;;  %v321_v57 = vld [vmem:[#allocation8 + $0x78] sm:$0xff]  ;;  %v915_v60 = vld [vmem:[#allocation2 + $0x48] sm:$0xff]  ;;  %v316_v63 = vld [vmem:[#allocation8 + $0x50] sm:$0xff] }
  0x26   :  { %615 = vmatpush.msra.mxu1 %v148_v7  ;;  %163 = vmatpush.msra.mxu0 %v148_v7  ;;  %v317_v62 = vld [vmem:[#allocation8 + $0x58] sm:$0xff]  ;;  %v315_v0 = vld [vmem:[#allocation8 + $0x48] sm:$0xff]  ;;  %v918_v1 = vld [vmem:[#allocation2 + $0x50] sm:$0xff] }
  0x27   :  { %620 = vmatpush.msra.mxu3 %v147_v8  ;;  %619 = vmatpush.msra.mxu2 %v147_v8  ;;  %v314_v2 = vld [vmem:[#allocation8 + $0x40] sm:$0xff]  ;;  %v313_v3 = vld [vmem:[#allocation8 + $0x38] sm:$0xff]  ;;  %v312_v4 = vld [vmem:[#allocation8 + $0x30] sm:$0xff] }
  0x28   :  { %618 = vmatpush.msra.mxu1 %v147_v8  ;;  %164 = vmatpush.msra.mxu0 %v147_v8  ;;  %v311_v5 = vld [vmem:[#allocation8 + $0x28] sm:$0xff]  ;;  %v921_v6 = vld [vmem:[#allocation2 + $0x58] sm:$0xff]  ;;  %v310_v7 = vld [vmem:[#allocation8 + $0x20] sm:$0xff] }
  0x29   :  { %623 = vmatpush.msra.mxu3 %v146_v9  ;;  %622 = vmatpush.msra.mxu2 %v146_v9  ;;  %v309_v8 = vld [vmem:[#allocation8 + $0x18] sm:$0xff] }
  0x2a   :  { %621 = vmatpush.msra.mxu1 %v146_v9  ;;  %165 = vmatpush.msra.mxu0 %v146_v9  ;;  %v308_v9 = vld [vmem:[#allocation8 + $0x10] sm:$0xff] }
  0x2b   :  { %626 = vmatpush.msra.mxu3 %v145_v10  ;;  %625 = vmatpush.msra.mxu2 %v145_v10 }
  0x2c   :  { %624 = vmatpush.msra.mxu1 %v145_v10  ;;  %166 = vmatpush.msra.mxu0 %v145_v10  ;;  %v924_v10 = vld [vmem:[#allocation2 + $0x60] sm:$0xff] }
  0x2d   :  { %629 = vmatpush.msra.mxu3 %v144_v11  ;;  %628 = vmatpush.msra.mxu2 %v144_v11 }
  0x2e   :  { %627 = vmatpush.msra.mxu1 %v144_v11  ;;  %167 = vmatpush.msra.mxu0 %v144_v11  ;;  %v307_v11 = vld [vmem:[#allocation8 + $0x8] sm:$0xff] }
  0x2f   :  { %632 = vmatpush.msra.mxu3 %v143_v12  ;;  %631 = vmatpush.msra.mxu2 %v143_v12 }
  0x30   :  { %630 = vmatpush.msra.mxu1 %v143_v12  ;;  %168 = vmatpush.msra.mxu0 %v143_v12  ;;  %v306_v12 = vld [vmem:[#allocation8] sm:$0xff] }
  0x31   :  { %635 = vmatpush.msra.mxu3 %v142_v13  ;;  %634 = vmatpush.msra.mxu2 %v142_v13 }
  0x32   :  { %633 = vmatpush.msra.mxu1 %v142_v13  ;;  %169 = vmatpush.msra.mxu0 %v142_v13  ;;  %v927_v13 = vld [vmem:[#allocation2 + $0x68] sm:$0xff] }
  0x33   :  { %638 = vmatpush.msra.mxu3 %v141_v14  ;;  %637 = vmatpush.msra.mxu2 %v141_v14 }
  0x34   :  { %636 = vmatpush.msra.mxu1 %v141_v14  ;;  %170 = vmatpush.msra.mxu0 %v141_v14  ;;  %v930_v14 = vld [vmem:[#allocation2 + $0x70] sm:$0xff] }
  0x35   :  { %641 = vmatpush.msra.mxu3 %v140_v15  ;;  %640 = vmatpush.msra.mxu2 %v140_v15 }
  0x36   :  { %208 = vmatmul.f32.vlgmr.msra.gmra.mxu3 %v136_v16  ;;  %196 = vmatmul.f32.vlgmr.msra.gmra.mxu2 %v132_v17  ;;  %v650_v16 = vld [vmem:[%s970_s3] ss:$0 sm:$0xff] }
  0x37   :  { %639 = vmatpush.msra.mxu1 %v140_v15  ;;  %171 = vmatpush.msra.mxu0 %v140_v15  ;;  %v933_v15 = vld [vmem:[#allocation2 + $0x78] sm:$0xff] }
  0x38   :  { %184 = vmatmul.f32.vlgmr.msra.gmra.mxu1 %v128_v18  ;;  %172 = vmatmul.f32.vlgmr.msra.gmra.mxu0 %v124_v19 }
  0x39   :  { %322 = vmatpush.msrb.mxu2 %v321_v57 }
  0x3b   :  { %323 = vmatpush.msrb.mxu2 %v320_v58 }
  0x3d   :  { %324 = vmatpush.msrb.mxu2 %v319_v59 }
  0x3e   :  { %211 = vmatmul.f32.gmra.mxu3 %v137_v20  ;;  %199 = vmatmul.f32.gmra.mxu2 %v133_v21 }
  0x3f   :  { %325 = vmatpush.msrb.mxu2 %v318_v61 }
  0x40   :  { %187 = vmatmul.f32.gmra.mxu1 %v129_v22  ;;  %175 = vmatmul.f32.gmra.mxu0 %v125_v23 }
  0x41   :  { %326 = vmatpush.msrb.mxu2 %v317_v62 }
  0x43   :  { %327 = vmatpush.msrb.mxu2 %v316_v63 }
  0x45   :  { %328 = vmatpush.msrb.mxu2 %v315_v0 }
  0x46   :  { %214 = vmatmul.f32.gmra.mxu3 %v138_v24  ;;  %202 = vmatmul.f32.gmra.mxu2 %v134_v25 }
  0x47   :  { %329 = vmatpush.msrb.mxu2 %v314_v2 }
  0x48   :  { %190 = vmatmul.f32.gmra.mxu1 %v130_v26  ;;  %178 = vmatmul.f32.gmra.mxu0 %v126_v27 }
  0x49   :  { %330 = vmatpush.msrb.mxu2 %v313_v3 }
  0x4b   :  { %331 = vmatpush.msrb.mxu2 %v312_v4 }
  0x4d   :  { %332 = vmatpush.msrb.mxu2 %v311_v5 }
  0x4e   :  { %217 = vmatmul.f32.gmra.mxu3 %v139_v28  ;;  %205 = vmatmul.f32.gmra.mxu2 %v135_v29 }
  0x4f   :  { %333 = vmatpush.msrb.mxu2 %v310_v7 }
  0x50   :  { %193 = vmatmul.f32.gmra.mxu1 %v131_v30  ;;  %181 = vmatmul.f32.gmra.mxu0 %v127_v31 }
  0x51   :  { %334 = vmatpush.msrb.mxu2 %v309_v8 }
  0x53   :  { %335 = vmatpush.msrb.mxu2 %v308_v9 }
  0x55   :  { %336 = vmatpush.msrb.mxu2 %v307_v11 }
  0x57   :  { %337 = vmatpush.msrb.mxu2 %v306_v12 }
  0xb5   :  { %v185_v35 = vpop.f32.mrf.mxu1  ;;  %v173_v38 = vpop.f32.mrf.mxu0 }
  0xb9   :  { %v209_v32 = vpop.f32.mrf.mxu3  ;;  %v197_v33 = vpop.f32.mrf.mxu2 }
  0xbd   :  { %v188_v39 = vpop.f32.mrf.mxu1  ;;  %v176_v42 = vpop.f32.mrf.mxu0 }
  0xc1   :  { %v212_v34 = vpop.f32.mrf.mxu3  ;;  %v200_v36 = vpop.f32.mrf.mxu2 }
  0xc5   :  { %v191_v43 = vpop.f32.mrf.mxu1  ;;  %v179_v45 = vpop.f32.mrf.mxu0 }
  0xc9   :  { %v215_v37 = vpop.f32.mrf.mxu3  ;;  %v203_v40 = vpop.f32.mrf.mxu2 }
  0xcd   :  { %v194_v46 = vpop.f32.mrf.mxu1  ;;  %v182_v47 = vpop.f32.mrf.mxu0 }
  0xd1   :  { %v218_v41 = vpop.f32.mrf.mxu3  ;;  %v206_v44 = vpop.f32.mrf.mxu2 }
  0xd2   :  { %225 = vmatpush.msrb.mxu1 %v218_v41 }
  0xd4   :  { %226 = vmatpush.msrb.mxu1 %v215_v37 }
  0xd6   :  { %227 = vmatpush.msrb.mxu1 %v212_v34 }
  0xd8   :  { %228 = vmatpush.msrb.mxu1 %v209_v32 }
  0xda   :  { %229 = vmatpush.msrb.mxu1 %v206_v44 }
  0xdc   :  { %230 = vmatpush.msrb.mxu1 %v203_v40 }
  0xde   :  { %231 = vmatpush.msrb.mxu1 %v200_v36 }
  0xe0   :  { %232 = vmatpush.msrb.mxu1 %v197_v33 }
  0xe2   :  { %233 = vmatpush.msrb.mxu1 %v194_v46 }
  0xe4   :  { %234 = vmatpush.msrb.mxu1 %v191_v43 }
  0xe6   :  { %235 = vmatpush.msrb.mxu1 %v188_v39 }
  0xe8   :  { %236 = vmatpush.msrb.mxu1 %v185_v35 }
  0xea   :  { %237 = vmatpush.msrb.mxu1 %v182_v47 }
  0xec   :  { %238 = vmatpush.msrb.mxu1 %v179_v45 }
  0xee   :  { %239 = vmatpush.msrb.mxu1 %v176_v42 }
  0xf0   :  { %240 = vmatpush.msrb.mxu1 %v173_v38 }
  0xf1   :  { %241 = vmatmul.f32.vlgmr.msrb.gmra.mxu1 %v888_v48 }
  0xf9   :  { %244 = vmatmul.f32.gmra.mxu1 %v891_v49 }
 0x101   :  { %247 = vmatmul.f32.gmra.mxu1 %v894_v50 }
 0x109   :  { %250 = vmatmul.f32.gmra.mxu1 %v897_v51 }
 0x111   :  { %253 = vmatmul.f32.gmra.mxu1 %v900_v52 }
 0x119   :  { %256 = vmatmul.f32.gmra.mxu1 %v903_v53 }
 0x121   :  { %259 = vmatmul.f32.gmra.mxu1 %v906_v54 }
 0x129   :  { %262 = vmatmul.f32.gmra.mxu1 %v909_v55 }
 0x131   :  { %265 = vmatmul.f32.gmra.mxu1 %v912_v56 }
 0x139   :  { %268 = vmatmul.f32.gmra.mxu1 %v915_v60 }
 0x141   :  { %271 = vmatmul.f32.gmra.mxu1 %v918_v1 }
 0x149   :  { %274 = vmatmul.f32.gmra.mxu1 %v921_v6 }
 0x151   :  { %277 = vmatmul.f32.gmra.mxu1 %v924_v10 }
 0x159   :  { %280 = vmatmul.f32.gmra.mxu1 %v927_v13 }
 0x161   :  { %283 = vmatmul.f32.gmra.mxu1 %v930_v14 }
 0x169   :  { %286 = vmatmul.f32.gmra.mxu1 %v933_v15 }
 0x16e   :  { %v242_v17 = vpop.f32.mrf.mxu1 }
 0x16f   :  { %v243_v18 = vadd.f32 %v650_v16, %v242_v17 }
 0x171   :  { %v290_v19 = vmax.f32 %v243_v18, 0.0 }
 0x173   :  { %338 = vmatmul.f32.vlgmr.msrb.gmra.mxu2 %v290_v19 }
 0x176   :  { %v245_v20 = vpop.f32.mrf.mxu1 }
 0x177   :  { %v246_v21 = vadd.f32 %v650_v16, %v245_v20 }
 0x179   :  { %v291_v22 = vmax.f32 %v246_v21, 0.0 }
 0x17b   :  { %341 = vmatmul.f32.gmra.mxu2 %v291_v22 }
 0x17e   :  { %v248_v23 = vpop.f32.mrf.mxu1 }
 0x17f   :  { %v249_v24 = vadd.f32 %v650_v16, %v248_v23 }
 0x181   :  { %v292_v25 = vmax.f32 %v249_v24, 0.0 }
 0x183   :  { %344 = vmatmul.f32.gmra.mxu2 %v292_v25 }
 0x186   :  { %v251_v26 = vpop.f32.mrf.mxu1 }
 0x187   :  { %v252_v27 = vadd.f32 %v650_v16, %v251_v26 }
 0x189   :  { %v293_v28 = vmax.f32 %v252_v27, 0.0 }
 0x18b   :  { %347 = vmatmul.f32.gmra.mxu2 %v293_v28 }
 0x18e   :  { %v254_v29 = vpop.f32.mrf.mxu1 }
 0x18f   :  { %v255_v30 = vadd.f32 %v650_v16, %v254_v29 }
 0x191   :  { %v294_v31 = vmax.f32 %v255_v30, 0.0 }
 0x193   :  { %350 = vmatmul.f32.gmra.mxu2 %v294_v31 }
 0x196   :  { %v257_v32 = vpop.f32.mrf.mxu1 }
 0x197   :  { %v258_v33 = vadd.f32 %v650_v16, %v257_v32 }
 0x199   :  { %v295_v34 = vmax.f32 %v258_v33, 0.0 }
 0x19b   :  { %353 = vmatmul.f32.gmra.mxu2 %v295_v34  ;;  %v476_v34 = vld [vmem:[#allocation10 + $0x20] sm:$0xff] }
 0x19e   :  { %v260_v35 = vpop.f32.mrf.mxu1 }
 0x19f   :  { %v261_v36 = vadd.f32 %v650_v16, %v260_v35  ;;  %v475_v35 = vld [vmem:[#allocation10 + $0x18] sm:$0xff] }
 0x1a1   :  { %v296_v37 = vmax.f32 %v261_v36, 0.0  ;;  %v473_v36 = vld [vmem:[#allocation10 + $0x8] sm:$0xff] }
 0x1a3   :  { %356 = vmatmul.f32.gmra.mxu2 %v296_v37  ;;  %v472_v37 = vld [vmem:[#allocation10] sm:$0xff] }
 0x1a6   :  { %v263_v38 = vpop.f32.mrf.mxu1 }
 0x1a7   :  { %v264_v39 = vadd.f32 %v650_v16, %v263_v38 }
 0x1a9   :  { %v297_v40 = vmax.f32 %v264_v39, 0.0 }
 0x1ab   :  { %359 = vmatmul.f32.gmra.mxu2 %v297_v40 }
 0x1ae   :  { %v266_v41 = vpop.f32.mrf.mxu1 }
 0x1af   :  { %v267_v42 = vadd.f32 %v650_v16, %v266_v41 }
 0x1b1   :  { %v298_v43 = vmax.f32 %v267_v42, 0.0 }
 0x1b3   :  { %362 = vmatmul.f32.gmra.mxu2 %v298_v43 }
 0x1b6   :  { %v269_v44 = vpop.f32.mrf.mxu1 }
 0x1b7   :  { %v270_v45 = vadd.f32 %v650_v16, %v269_v44 }
 0x1b9   :  { %v299_v46 = vmax.f32 %v270_v45, 0.0 }
 0x1bb   :  { %365 = vmatmul.f32.gmra.mxu2 %v299_v46 }
 0x1be   :  { %v272_v47 = vpop.f32.mrf.mxu1 }
 0x1bf   :  { %v273_v57 = vadd.f32 %v650_v16, %v272_v47 }
 0x1c1   :  { %v300_v58 = vmax.f32 %v273_v57, 0.0 }
 0x1c3   :  { %368 = vmatmul.f32.gmra.mxu2 %v300_v58 }
 0x1c6   :  { %v275_v59 = vpop.f32.mrf.mxu1 }
 0x1c7   :  { %v276_v61 = vadd.f32 %v650_v16, %v275_v59 }
 0x1c9   :  { %v301_v62 = vmax.f32 %v276_v61, 0.0 }
 0x1cb   :  { %371 = vmatmul.f32.gmra.mxu2 %v301_v62 }
 0x1ce   :  { %v278_v63 = vpop.f32.mrf.mxu1 }
 0x1cf   :  { %v279_v0 = vadd.f32 %v650_v16, %v278_v63 }
 0x1d1   :  { %v302_v2 = vmax.f32 %v279_v0, 0.0 }
 0x1d3   :  { %374 = vmatmul.f32.gmra.mxu2 %v302_v2 }
 0x1d6   :  { %v281_v3 = vpop.f32.mrf.mxu1 }
 0x1d7   :  { %v282_v4 = vadd.f32 %v650_v16, %v281_v3 }
 0x1d9   :  { %v303_v5 = vmax.f32 %v282_v4, 0.0 }
 0x1db   :  { %377 = vmatmul.f32.gmra.mxu2 %v303_v5 }
 0x1de   :  { %v284_v7 = vpop.f32.mrf.mxu1 }
 0x1df   :  { %v285_v8 = vadd.f32 %v650_v16, %v284_v7 }
 0x1e1   :  { %v304_v9 = vmax.f32 %v285_v8, 0.0 }
 0x1e3   :  { %380 = vmatmul.f32.gmra.mxu2 %v304_v9 }
 0x1e6   :  { %v287_v11 = vpop.f32.mrf.mxu1 }
 0x1e7   :  { %v288_v12 = vadd.f32 %v650_v16, %v287_v11  ;;  %v487_v16 = vld [vmem:[#allocation10 + $0x78] sm:$0xff] }
 0x1e8   :  { %492 = vmatpush.msrb.mxu0 %v487_v16 }
 0x1e9   :  { %v305_v17 = vmax.f32 %v288_v12, 0.0 }
 0x1eb   :  { %383 = vmatmul.f32.gmra.mxu2 %v305_v17 }
 0x1f6   :  { %v339_v18 = vpop.f32.mrf.mxu2 }
 0x1fe   :  { %v342_v19 = vpop.f32.mrf.mxu2 }
 0x206   :  { %v345_v20 = vpop.f32.mrf.mxu2 }
 0x20e   :  { %v348_v21 = vpop.f32.mrf.mxu2 }
 0x216   :  { %v351_v22 = vpop.f32.mrf.mxu2 }
 0x21e   :  { %v354_v23 = vpop.f32.mrf.mxu2 }
 0x226   :  { %v357_v24 = vpop.f32.mrf.mxu2 }
 0x22e   :  { %v360_v25 = vpop.f32.mrf.mxu2 }
 0x236   :  { %v363_v26 = vpop.f32.mrf.mxu2 }
 0x23e   :  { %v366_v27 = vpop.f32.mrf.mxu2 }
 0x246   :  { %v369_v28 = vpop.f32.mrf.mxu2 }
 0x24e   :  { %v372_v29 = vpop.f32.mrf.mxu2 }
 0x256   :  { %v375_v30 = vpop.f32.mrf.mxu2 }
 0x25e   :  { %v378_v31 = vpop.f32.mrf.mxu2 }
 0x266   :  { %v381_v32 = vpop.f32.mrf.mxu2 }
 0x26e   :  { %v384_v33 = vpop.f32.mrf.mxu2 }
 0x26f   :  { %391 = vmatpush.msrb.mxu3 %v384_v33 }
 0x271   :  { %392 = vmatpush.msrb.mxu3 %v381_v32 }
 0x273   :  { %393 = vmatpush.msrb.mxu3 %v378_v31 }
 0x275   :  { %394 = vmatpush.msrb.mxu3 %v375_v30 }
 0x277   :  { %395 = vmatpush.msrb.mxu3 %v372_v29 }
 0x279   :  { %396 = vmatpush.msrb.mxu3 %v369_v28 }
 0x27b   :  { %397 = vmatpush.msrb.mxu3 %v366_v27 }
 0x27d   :  { %398 = vmatpush.msrb.mxu3 %v363_v26 }
 0x27f   :  { %399 = vmatpush.msrb.mxu3 %v360_v25 }
 0x281   :  { %400 = vmatpush.msrb.mxu3 %v357_v24 }
 0x283   :  { %401 = vmatpush.msrb.mxu3 %v354_v23 }
 0x285   :  { %402 = vmatpush.msrb.mxu3 %v351_v22 }
 0x287   :  { %403 = vmatpush.msrb.mxu3 %v348_v21 }
 0x289   :  { %404 = vmatpush.msrb.mxu3 %v345_v20 }
 0x28b   :  { %405 = vmatpush.msrb.mxu3 %v342_v19 }
 0x28d   :  { %406 = vmatpush.msrb.mxu3 %v339_v18 }
 0x28e   :  { %407 = vmatmul.f32.vlgmr.msrb.gmra.mxu3 %v888_v48  ;;  %v486_v48 = vld [vmem:[#allocation10 + $0x70] sm:$0xff] }
 0x28f   :  { %493 = vmatpush.msrb.mxu0 %v486_v48  ;;  %v652_v48 = vld [vmem:[%s974_s7] ss:$0 sm:$0xff]  ;;  %s812_s7 = smov [#allocation11]  }
 0x290   :  { %s577_s9 = sshll.u32 %s812_s7, 4  ;;  %s578_s9 = int_to_ptr.vmem [resolvable:$true] %s577_s9 }
 0x296   :  { %410 = vmatmul.f32.gmra.mxu3 %v891_v49  ;;  %v485_v49 = vld [vmem:[#allocation10 + $0x68] sm:$0xff] }
 0x297   :  { %494 = vmatpush.msrb.mxu0 %v485_v49 }
 0x29e   :  { %413 = vmatmul.f32.gmra.mxu3 %v894_v50  ;;  %v484_v50 = vld [vmem:[#allocation10 + $0x60] sm:$0xff] }
 0x29f   :  { %495 = vmatpush.msrb.mxu0 %v484_v50 }
 0x2a6   :  { %416 = vmatmul.f32.gmra.mxu3 %v897_v51  ;;  %v483_v51 = vld [vmem:[#allocation10 + $0x58] sm:$0xff] }
 0x2a7   :  { %496 = vmatpush.msrb.mxu0 %v483_v51 }
 0x2ae   :  { %419 = vmatmul.f32.gmra.mxu3 %v900_v52  ;;  %v482_v52 = vld [vmem:[#allocation10 + $0x50] sm:$0xff] }
 0x2af   :  { %497 = vmatpush.msrb.mxu0 %v482_v52 }
 0x2b6   :  { %422 = vmatmul.f32.gmra.mxu3 %v903_v53  ;;  %v481_v53 = vld [vmem:[#allocation10 + $0x48] sm:$0xff] }
 0x2b7   :  { %498 = vmatpush.msrb.mxu0 %v481_v53 }
 0x2be   :  { %425 = vmatmul.f32.gmra.mxu3 %v906_v54  ;;  %v480_v54 = vld [vmem:[#allocation10 + $0x40] sm:$0xff] }
 0x2bf   :  { %499 = vmatpush.msrb.mxu0 %v480_v54 }
 0x2c6   :  { %428 = vmatmul.f32.gmra.mxu3 %v909_v55  ;;  %v479_v55 = vld [vmem:[#allocation10 + $0x38] sm:$0xff] }
 0x2c7   :  { %500 = vmatpush.msrb.mxu0 %v479_v55 }
 0x2ce   :  { %431 = vmatmul.f32.gmra.mxu3 %v912_v56  ;;  %v478_v56 = vld [vmem:[#allocation10 + $0x30] sm:$0xff] }
 0x2cf   :  { %501 = vmatpush.msrb.mxu0 %v478_v56 }
 0x2d6   :  { %434 = vmatmul.f32.gmra.mxu3 %v915_v60  ;;  %v477_v60 = vld [vmem:[#allocation10 + $0x28] sm:$0xff] }
 0x2d7   :  { %502 = vmatpush.msrb.mxu0 %v477_v60 }
 0x2d9   :  { %503 = vmatpush.msrb.mxu0 %v476_v34 }
 0x2db   :  { %504 = vmatpush.msrb.mxu0 %v475_v35 }
 0x2de   :  { %437 = vmatmul.f32.gmra.mxu3 %v918_v1  ;;  %v474_v1 = vld [vmem:[#allocation10 + $0x10] sm:$0xff] }
 0x2df   :  { %505 = vmatpush.msrb.mxu0 %v474_v1 }
 0x2e1   :  { %506 = vmatpush.msrb.mxu0 %v473_v36 }
 0x2e3   :  { %507 = vmatpush.msrb.mxu0 %v472_v37 }
 0x2e6   :  { %440 = vmatmul.f32.gmra.mxu3 %v921_v6  ;;  %v651_v6 = vld [vmem:[%s972_s5] ss:$0 sm:$0xff] }
 0x2ee   :  { %443 = vmatmul.f32.gmra.mxu3 %v924_v10 }
 0x2f6   :  { %446 = vmatmul.f32.gmra.mxu3 %v927_v13 }
 0x2fe   :  { %449 = vmatmul.f32.gmra.mxu3 %v930_v14 }
 0x306   :  { %452 = vmatmul.f32.gmra.mxu3 %v933_v15 }
 0x311   :  { %v408_v38 = vpop.f32.mrf.mxu3 }
 0x312   :  { %v409_v39 = vadd.f32 %v651_v6, %v408_v38 }
 0x314   :  { %v456_v10 = vmax.f32 %v409_v39, 0.0 }
 0x316   :  { %508 = vmatmul.f32.vlgmr.msrb.gmra.mxu0 %v456_v10 }
 0x319   :  { %v411_v40 = vpop.f32.mrf.mxu3 }
 0x31a   :  { %v412_v41 = vadd.f32 %v651_v6, %v411_v40 }
 0x31c   :  { %v457_v42 = vmax.f32 %v412_v41, 0.0 }
 0x31e   :  { %511 = vmatmul.f32.gmra.mxu0 %v457_v42 }
 0x321   :  { %v414_v43 = vpop.f32.mrf.mxu3 }
 0x322   :  { %v415_v44 = vadd.f32 %v651_v6, %v414_v43 }
 0x324   :  { %v458_v45 = vmax.f32 %v415_v44, 0.0 }
 0x326   :  { %514 = vmatmul.f32.gmra.mxu0 %v458_v45 }
 0x329   :  { %v417_v13 = vpop.f32.mrf.mxu3 }
 0x32a   :  { %v418_v14 = vadd.f32 %v651_v6, %v417_v13 }
 0x32c   :  { %v459_v46 = vmax.f32 %v418_v14, 0.0 }
 0x32e   :  { %517 = vmatmul.f32.gmra.mxu0 %v459_v46 }
 0x331   :  { %v420_v15 = vpop.f32.mrf.mxu3 }
 0x332   :  { %v421_v47 = vadd.f32 %v651_v6, %v420_v15 }
 0x334   :  { %v460_v57 = vmax.f32 %v421_v47, 0.0 }
 0x336   :  { %520 = vmatmul.f32.gmra.mxu0 %v460_v57 }
 0x339   :  { %v423_v58 = vpop.f32.mrf.mxu3 }
 0x33a   :  { %v424_v59 = vadd.f32 %v651_v6, %v423_v58 }
 0x33c   :  { %v461_v61 = vmax.f32 %v424_v59, 0.0 }
 0x33e   :  { %523 = vmatmul.f32.gmra.mxu0 %v461_v61 }
 0x341   :  { %v426_v62 = vpop.f32.mrf.mxu3 }
 0x342   :  { %v427_v63 = vadd.f32 %v651_v6, %v426_v62 }
 0x344   :  { %v462_v0 = vmax.f32 %v427_v63, 0.0 }
 0x346   :  { %526 = vmatmul.f32.gmra.mxu0 %v462_v0 }
 0x349   :  { %v429_v2 = vpop.f32.mrf.mxu3 }
 0x34a   :  { %v430_v3 = vadd.f32 %v651_v6, %v429_v2 }
 0x34c   :  { %v463_v4 = vmax.f32 %v430_v3, 0.0 }
 0x34e   :  { %529 = vmatmul.f32.gmra.mxu0 %v463_v4 }
 0x351   :  { %v432_v5 = vpop.f32.mrf.mxu3 }
 0x352   :  { %v433_v7 = vadd.f32 %v651_v6, %v432_v5 }
 0x354   :  { %v464_v8 = vmax.f32 %v433_v7, 0.0 }
 0x356   :  { %532 = vmatmul.f32.gmra.mxu0 %v464_v8 }
 0x359   :  { %v435_v9 = vpop.f32.mrf.mxu3 }
 0x35a   :  { %v436_v11 = vadd.f32 %v651_v6, %v435_v9 }
 0x35c   :  { %v465_v12 = vmax.f32 %v436_v11, 0.0 }
 0x35e   :  { %535 = vmatmul.f32.gmra.mxu0 %v465_v12 }
 0x361   :  { %v438_v17 = vpop.f32.mrf.mxu3 }
 0x362   :  { %v439_v18 = vadd.f32 %v651_v6, %v438_v17 }
 0x364   :  { %v466_v19 = vmax.f32 %v439_v18, 0.0 }
 0x366   :  { %538 = vmatmul.f32.gmra.mxu0 %v466_v19 }
 0x369   :  { %v441_v20 = vpop.f32.mrf.mxu3 }
 0x36a   :  { %v442_v21 = vadd.f32 %v651_v6, %v441_v20 }
 0x36c   :  { %v467_v22 = vmax.f32 %v442_v21, 0.0 }
 0x36e   :  { %541 = vmatmul.f32.gmra.mxu0 %v467_v22 }
 0x371   :  { %v444_v23 = vpop.f32.mrf.mxu3 }
 0x372   :  { %v445_v24 = vadd.f32 %v651_v6, %v444_v23 }
 0x374   :  { %v468_v25 = vmax.f32 %v445_v24, 0.0 }
 0x376   :  { %544 = vmatmul.f32.gmra.mxu0 %v468_v25 }
 0x379   :  { %v447_v26 = vpop.f32.mrf.mxu3 }
 0x37a   :  { %v448_v27 = vadd.f32 %v651_v6, %v447_v26 }
 0x37c   :  { %v469_v28 = vmax.f32 %v448_v27, 0.0 }
 0x37e   :  { %547 = vmatmul.f32.gmra.mxu0 %v469_v28 }
 0x381   :  { %v450_v29 = vpop.f32.mrf.mxu3 }
 0x382   :  { %v451_v30 = vadd.f32 %v651_v6, %v450_v29 }
 0x384   :  { %v470_v31 = vmax.f32 %v451_v30, 0.0 }
 0x386   :  { %550 = vmatmul.f32.gmra.mxu0 %v470_v31 }
 0x389   :  { %v453_v32 = vpop.f32.mrf.mxu3 }
 0x38a   :  { %v454_v33 = vadd.f32 %v651_v6, %v453_v32 }
 0x38c   :  { %v471_v16 = vmax.f32 %v454_v33, 0.0 }
 0x38e   :  { %553 = vmatmul.f32.gmra.mxu0 %v471_v16 }
 0x393   :  { %v509_v49 = vpop.f32.mrf.mxu0 }
 0x394   :  { %v510_v50 = vadd.f32 %v652_v48, %v509_v49 }
 0x396   :  { %557 = vst [vmem:[#allocation11] sm:$0xff] %v510_v50 }
 0x39b   :  { %v512_v51 = vpop.f32.mrf.mxu0 }
 0x39c   :  { %v513_v52 = vadd.f32 %v652_v48, %v512_v51 }
 0x39e   :  { %558 = vst [vmem:[#allocation11 + $0x8] sm:$0xff] %v513_v52 }
 0x3a3   :  { %v515_v53 = vpop.f32.mrf.mxu0 }
 0x3a4   :  { %v516_v54 = vadd.f32 %v652_v48, %v515_v53 }
 0x3a6   :  { %559 = vst [vmem:[#allocation11 + $0x10] sm:$0xff] %v516_v54 }
 0x3ab   :  { %v518_v55 = vpop.f32.mrf.mxu0 }
 0x3ac   :  { %v519_v56 = vadd.f32 %v652_v48, %v518_v55 }
 0x3ae   :  { %560 = vst [vmem:[#allocation11 + $0x18] sm:$0xff] %v519_v56 }
 0x3b3   :  { %v521_v60 = vpop.f32.mrf.mxu0 }
 0x3b4   :  { %v522_v34 = vadd.f32 %v652_v48, %v521_v60 }
 0x3b6   :  { %561 = vst [vmem:[#allocation11 + $0x20] sm:$0xff] %v522_v34 }
 0x3bb   :  { %v524_v35 = vpop.f32.mrf.mxu0 }
 0x3bc   :  { %v525_v1 = vadd.f32 %v652_v48, %v524_v35 }
 0x3be   :  { %562 = vst [vmem:[#allocation11 + $0x28] sm:$0xff] %v525_v1 }
 0x3c3   :  { %v527_v36 = vpop.f32.mrf.mxu0 }
 0x3c4   :  { %v528_v37 = vadd.f32 %v652_v48, %v527_v36 }
 0x3c6   :  { %563 = vst [vmem:[#allocation11 + $0x30] sm:$0xff] %v528_v37 }
 0x3cb   :  { %v530_v6 = vpop.f32.mrf.mxu0 }
 0x3cc   :  { %v531_v38 = vadd.f32 %v652_v48, %v530_v6 }
 0x3ce   :  { %564 = vst [vmem:[#allocation11 + $0x38] sm:$0xff] %v531_v38 }
 0x3d3   :  { %v533_v39 = vpop.f32.mrf.mxu0 }
 0x3d4   :  { %v534_v10 = vadd.f32 %v652_v48, %v533_v39 }
 0x3d6   :  { %565 = vst [vmem:[#allocation11 + $0x40] sm:$0xff] %v534_v10 }
 0x3db   :  { %v536_v40 = vpop.f32.mrf.mxu0 }
 0x3dc   :  { %v537_v41 = vadd.f32 %v652_v48, %v536_v40 }
 0x3de   :  { %566 = vst [vmem:[#allocation11 + $0x48] sm:$0xff] %v537_v41 }
 0x3e3   :  { %v539_v42 = vpop.f32.mrf.mxu0 }
 0x3e4   :  { %v540_v43 = vadd.f32 %v652_v48, %v539_v42 }
 0x3e6   :  { %567 = vst [vmem:[#allocation11 + $0x50] sm:$0xff] %v540_v43 }
 0x3eb   :  { %v542_v44 = vpop.f32.mrf.mxu0 }
 0x3ec   :  { %v543_v45 = vadd.f32 %v652_v48, %v542_v44 }
 0x3ee   :  { %568 = vst [vmem:[#allocation11 + $0x58] sm:$0xff] %v543_v45 }
 0x3f3   :  { %v545_v13 = vpop.f32.mrf.mxu0 }
 0x3f4   :  { %v546_v14 = vadd.f32 %v652_v48, %v545_v13 }
 0x3f6   :  { %569 = vst [vmem:[#allocation11 + $0x60] sm:$0xff] %v546_v14 }
 0x3fb   :  { %v548_v46 = vpop.f32.mrf.mxu0 }
 0x3fc   :  { %v549_v15 = vadd.f32 %v652_v48, %v548_v46 }
 0x3fe   :  { %570 = vst [vmem:[#allocation11 + $0x68] sm:$0xff] %v549_v15 }
 0x403   :  { %v551_v47 = vpop.f32.mrf.mxu0 }
 0x404   :  { %v552_v57 = vadd.f32 %v652_v48, %v551_v47 }
 0x406   :  { %571 = vst [vmem:[#allocation11 + $0x70] sm:$0xff] %v552_v57 }
 0x40b   :  { %v554_v58 = vpop.f32.mrf.mxu0 }
 0x40c   :  { %v555_v59 = vadd.f32 %v652_v48, %v554_v58 }
 0x40e   :  { %572 = vst [vmem:[#allocation11 + $0x78] sm:$0xff] %v555_v59 }
 0x40f   :  { %585 = dma.vmem_to_hbm [thread:$0]  %s578_s9, 2048, %s580_s12, [#allocation4], %s806_s13, %s806_s13, %s807_s14  }
 0x410   :  { %803 = dma.done.wait [#allocation4], 2048  }
 0x411   :  { %804 = vsyncadd [#allocation4], 4294965248 }
 0x412   :  { %590 = vsyncpa [#allocation3], 1 }
 0x413   :  { %591 = vsyncpa [#allocation6], 1 }
 0x414   :  { %592 = vsyncpa [#allocation9], 1 }
 0x415   :  { %593 = vsyncpa [#allocation4], 1 }

</bundles_post_ra>
